<compile_context>
chip_gen: v6e
topology: v6e:2x2x1
jax: 0.10.0
libtpu: 0.0.40
codegen_flags: <defaults>
</compile_context>

<pallas_src>
import math

import jax
import jax.numpy as jnp
from jax.experimental import pallas as pl
from jax.experimental.pallas import tpu as pltpu

LANE = 128
SUBLANE = 8
_ROW_TILE_CAP = 128      # rows (b*c pairs) per block
_COL_TILE_CAP = 2048     # spatial columns per block (f32: 128*2048*4 = 1 MiB)
_PAD_NEG = -1e30         # sigmoid(-1e30) == 0.0 -> padded columns contribute 0


def _stats_kernel(x_ref, t_ref, a_ref, sp_ref, st_ref, sa_ref, spt_ref, spa_ref):
    """Accumulate per-row sums of p, t, a, p*t, p*a  (p = sigmoid(x))."""
    j = pl.program_id(1)  # spatial reduction axis (last grid axis)

    @pl.when(j == 0)
    def _():
        sp_ref[...] = jnp.zeros_like(sp_ref)
        st_ref[...] = jnp.zeros_like(st_ref)
        sa_ref[...] = jnp.zeros_like(sa_ref)
        spt_ref[...] = jnp.zeros_like(spt_ref)
        spa_ref[...] = jnp.zeros_like(spa_ref)

    x = x_ref[...].astype(jnp.float32)
    t = t_ref[...].astype(jnp.float32)
    a = a_ref[...].astype(jnp.float32)

    # Stable sigmoid: x = -1e30 -> exp(1e30) = inf -> p = 0 exactly (no NaN).
    p = 1.0 / (1.0 + jnp.exp(-x))

    sp_ref[...] += jnp.sum(p, axis=-1, keepdims=True)
    st_ref[...] += jnp.sum(t, axis=-1, keepdims=True)
    sa_ref[...] += jnp.sum(a, axis=-1, keepdims=True)
    spt_ref[...] += jnp.sum(p * t, axis=-1, keepdims=True)
    spa_ref[...] += jnp.sum(p * a, axis=-1, keepdims=True)


def _round_up(a, b):
    return (a + b - 1) // b * b


def _divisor_tile(padded, unit, cap):
    """Largest multiple of `unit` <= cap that divides `padded` (>= unit)."""
    t = min(padded, (cap // unit) * unit)
    while t > unit and padded % t:
        t -= unit
    return max(t, unit)


def _per_row_sums(x2, t2, a2):
    """x2/t2/a2: (N, M) views (native dtype). Returns five (N,) f32 sums:
    sum p, sum t, sum a, sum p*t, sum p*a with p = sigmoid(x)."""
    n, m = x2.shape

    n_pad = _round_up(n, SUBLANE)
    tn = _divisor_tile(n_pad, SUBLANE, _ROW_TILE_CAP)

    m_pad = _round_up(m, LANE)
    tm = _divisor_tile(m_pad, LANE, _COL_TILE_CAP)
    if tm < 512 and m_pad > _COL_TILE_CAP:
        # Divisor tile would be tiny for a big array: pad a bit more instead and
        # use large regular tiles (per-grid-step overhead otherwise dominates).
        tm = _COL_TILE_CAP
        m_pad = _round_up(m, tm)

    if (n_pad, m_pad) != (n, m):
        cfg = ((0, n_pad - n), (0, m_pad - m))
        x2 = jnp.pad(x2, cfg, constant_values=_PAD_NEG)
        t2 = jnp.pad(t2, cfg)
        a2 = jnp.pad(a2, cfg)

    grid = (n_pad // tn, m_pad // tm)
    in_spec = pl.BlockSpec((tn, tm), lambda i, j: (i, j))
    out_spec = pl.BlockSpec((tn, 1), lambda i, j: (i, 0))
    out_sds = jax.ShapeDtypeStruct((n_pad, 1), jnp.float32)

    outs = pl.pallas_call(
        _stats_kernel,
        out_shape=(out_sds,) * 5,
        grid_spec=pltpu.PrefetchScalarGridSpec(
            num_scalar_prefetch=0,
            grid=grid,
            in_specs=[in_spec, in_spec, in_spec],
            out_specs=[out_spec] * 5,
        ),
        compiler_params=pltpu.CompilerParams(
            dimension_semantics=("parallel", "arbitrary"),
        ),
    )(x2, t2, a2)

    return tuple(o[:n, 0] for o in outs)


def _masked_mean_losses(sum_p, sum_y, sum_py, *, alpha, beta, smooth, eps, log_loss):
    """Per-class sums -> (dice_loss, tversky_loss), smp semantics."""
    inter = sum_py
    fp = sum_p - inter
    fn = sum_y - inter

    dice_score = (2.0 * inter + smooth) / jnp.maximum(sum_p + sum_y + smooth, eps)
    tversky_score = (inter + smooth) / jnp.maximum(
        inter + alpha * fp + beta * fn + smooth, eps)

    if log_loss:
        dice_l = -jnp.log(jnp.maximum(dice_score, eps))
        tversky_l = -jnp.log(jnp.maximum(tversky_score, eps))
    else:
        dice_l = 1.0 - dice_score
        tversky_l = 1.0 - tversky_score

    valid = (sum_y > 0).astype(jnp.float32)  # classes with no positives -> 0 loss
    return jnp.mean(dice_l * valid), jnp.mean(tversky_l * valid)


def dice_tversky_loss_v1(outputs, target, individual_mask, *, mode="multilabel",
                         log_loss=False, smooth=0.0, eps=1e-7,
                         base_weight=0.5, aux_weight=0.5, tversky_weight=0.5,
                         alpha=0.5, beta=0.5):
    """Forward pass of DiceTverskyLossV1 (from_logits=True)."""
    assert outputs.shape == target.shape == individual_mask.shape
    assert outputs.ndim >= 2
    if mode not in ("binary", "multilabel"):
        # TODO(synk): smp multiclass mode (log_softmax + one-hot target gather)
        # is not implemented.
        raise NotImplementedError(mode)

    b, c = outputs.shape[0], outputs.shape[1]
    n = b * c
    m = int(math.prod(outputs.shape[2:]))

    x2 = outputs.reshape(n, m)
    t2 = target.reshape(n, m)
    a2 = individual_mask.reshape(n, m)

    sum_p, sum_t, sum_a, sum_pt, sum_pa = _per_row_sums(x2, t2, a2)

    if mode == "binary":
        agg = lambda s: jnp.sum(s)[None]                       # one aggregate class
    else:  # multilabel: per class, summed over batch and spatial dims
        agg = lambda s: jnp.sum(s.reshape(b, c), axis=0)

    p_c, t_c, a_c = agg(sum_p), agg(sum_t), agg(sum_a)
    pt_c, pa_c = agg(sum_pt), agg(sum_pa)

    dice_loss, tversky_loss = _masked_mean_losses(
        p_c, t_c, pt_c, alpha=alpha, beta=beta, smooth=smooth, eps=eps,
        log_loss=log_loss)
    aux_dice_loss, _ = _masked_mean_losses(
        p_c, a_c, pa_c, alpha=alpha, beta=beta, smooth=smooth, eps=eps,
        log_loss=log_loss)

    return (base_weight * dice_loss + aux_weight * aux_dice_loss
            + tversky_weight * tversky_loss)


def _reference_dice_tversky(outputs, target, individual_mask, *, mode="multilabel",
                            log_loss=False, smooth=0.0, eps=1e-7,
                            base_weight=0.5, aux_weight=0.5, tversky_weight=0.5,
                            alpha=0.5, beta=0.5):
    """Pure-jnp reference mirroring smp.losses.DiceLoss / TverskyLoss."""
    x = outputs.astype(jnp.float32)
    p = 1.0 / (1.0 + jnp.exp(-x))
    b, c = outputs.shape[:2]
    shape = (b, 1, -1) if mode == "binary" else (b, c, -1)
    p3 = p.reshape(shape)
    t3 = target.astype(jnp.float32).reshape(shape)
    a3 = individual_mask.astype(jnp.float32).reshape(shape)
    dims = (0, 2)

    def dice(y):
        inter = jnp.sum(p3 * y, dims)
        card = jnp.sum(p3 + y, dims)
        score = (2.0 * inter + smooth) / jnp.maximum(card + smooth, eps)
        l = -jnp.log(jnp.maximum(score, eps)) if log_loss else 1.0 - score
        return jnp.mean(l * (jnp.sum(y, dims) > 0))

    def tversky(y):
        inter = jnp.sum(p3 * y, dims)
        fp = jnp.sum(p3 * (1.0 - y), dims)
        fn = jnp.sum((1.0 - p3) * y, dims)
        score = (inter + smooth) / jnp.maximum(
            inter + alpha * fp + beta * fn + smooth, eps)
        l = -jnp.log(jnp.maximum(score, eps)) if log_loss else 1.0 - score
        return jnp.mean(l * (jnp.sum(y, dims) > 0))

    return (base_weight * dice(t3) + aux_weight * dice(a3)
            + tversky_weight * tversky(t3))


if __name__ == "__main__":
    key = jax.random.PRNGKey(0)
    k1, k2, k3 = jax.random.split(key, 3)

    B, C, H, W = 2, 4, 16, 16
    outputs = jax.random.normal(k1, (B, C, H, W), dtype=jnp.float32)          # logits
    target = (jax.random.uniform(k2, (B, C, H, W)) > 0.5).astype(jnp.float32)  # batch['target']
    individual_mask = (jax.random.uniform(k3, (B, C, H, W)) > 0.5).astype(jnp.float32)

    loss = dice_tversky_loss_v1(outputs, target, individual_mask)
    loss = jax.block_until_ready(loss)
    ref = _reference_dice_tversky(outputs, target, individual_mask)
    assert jnp.allclose(loss, ref, rtol=1e-5, atol=1e-6), (loss, ref)

    # Binary-mode path (single aggregated class) also matches.
    loss_b = jax.block_until_ready(
        dice_tversky_loss_v1(outputs, target, individual_mask, mode="binary"))
    ref_b = _reference_dice_tversky(outputs, target, individual_mask, mode="binary")
    assert jnp.allclose(loss_b, ref_b, rtol=1e-5, atol=1e-6), (loss_b, ref_b)

    print("KERNEL_OK")
</pallas_src>

<mosaic_0001>
module attributes {stable_mosaic.version = 11 : i64} {
  func.func @_stats_kernel(%arg0: i32, %arg1: i32, %arg2: memref<8x256xf32, #tpu.memory_space<vmem>>, %arg3: memref<8x256xf32, #tpu.memory_space<vmem>>, %arg4: memref<8x256xf32, #tpu.memory_space<vmem>>, %arg5: memref<8x1xf32, #tpu.memory_space<vmem>>, %arg6: memref<8x1xf32, #tpu.memory_space<vmem>>, %arg7: memref<8x1xf32, #tpu.memory_space<vmem>>, %arg8: memref<8x1xf32, #tpu.memory_space<vmem>>, %arg9: memref<8x1xf32, #tpu.memory_space<vmem>>) attributes {dimension_semantics = [#tpu.dimension_semantics<parallel>, #tpu.dimension_semantics<arbitrary>], iteration_bounds = array<i64: 1, 1>, scalar_prefetch = 0 : i64, scratch_operands = 0 : i64, tpu.core_type = #tpu.core_type<tc>, window_params = [{transform_indices = @transform_0, window_bounds = array<i64: 8, 256>}, {transform_indices = @transform_1, window_bounds = array<i64: 8, 256>}, {transform_indices = @transform_2, window_bounds = array<i64: 8, 256>}, {transform_indices = @transform_3, window_bounds = array<i64: 8, 1>}, {transform_indices = @transform_4, window_bounds = array<i64: 8, 1>}, {transform_indices = @transform_5, window_bounds = array<i64: 8, 1>}, {transform_indices = @transform_6, window_bounds = array<i64: 8, 1>}, {transform_indices = @transform_7, window_bounds = array<i64: 8, 1>}]} {
    %c0_i32 = arith.constant 0 : i32
    %0 = arith.cmpi eq, %arg1, %c0_i32 : i32
    %1 = arith.extui %0 : i1 to i32
    %c0_i32_0 = arith.constant 0 : i32
    %2 = arith.cmpi ne, %1, %c0_i32_0 : i32
    scf.if %2 {
      %cst_33 = arith.constant 0.000000e+00 : f32
      %40 = vector.broadcast %cst_33 : f32 to vector<8x1xf32>
      %c0_34 = arith.constant 0 : index
      %c0_35 = arith.constant 0 : index
      %41 = vector.load %arg5[%c0_34, %c0_35] : memref<8x1xf32, #tpu.memory_space<vmem>>, vector<8x1xf32>
      tpu.vector_store %arg5[%c0_34, %c0_35], %40 {strides = array<i32>} : memref<8x1xf32, #tpu.memory_space<vmem>>, vector<8x1xf32>,
      %cst_36 = arith.constant 0.000000e+00 : f32
      %42 = vector.broadcast %cst_36 : f32 to vector<8x1xf32>
      %c0_37 = arith.constant 0 : index
      %c0_38 = arith.constant 0 : index
      %43 = vector.load %arg6[%c0_37, %c0_38] : memref<8x1xf32, #tpu.memory_space<vmem>>, vector<8x1xf32>
      tpu.vector_store %arg6[%c0_37, %c0_38], %42 {strides = array<i32>} : memref<8x1xf32, #tpu.memory_space<vmem>>, vector<8x1xf32>,
      %cst_39 = arith.constant 0.000000e+00 : f32
      %44 = vector.broadcast %cst_39 : f32 to vector<8x1xf32>
      %c0_40 = arith.constant 0 : index
      %c0_41 = arith.constant 0 : index
      %45 = vector.load %arg7[%c0_40, %c0_41] : memref<8x1xf32, #tpu.memory_space<vmem>>, vector<8x1xf32>
      tpu.vector_store %arg7[%c0_40, %c0_41], %44 {strides = array<i32>} : memref<8x1xf32, #tpu.memory_space<vmem>>, vector<8x1xf32>,
      %cst_42 = arith.constant 0.000000e+00 : f32
      %46 = vector.broadcast %cst_42 : f32 to vector<8x1xf32>
      %c0_43 = arith.constant 0 : index
      %c0_44 = arith.constant 0 : index
      %47 = vector.load %arg8[%c0_43, %c0_44] : memref<8x1xf32, #tpu.memory_space<vmem>>, vector<8x1xf32>
      tpu.vector_store %arg8[%c0_43, %c0_44], %46 {strides = array<i32>} : memref<8x1xf32, #tpu.memory_space<vmem>>, vector<8x1xf32>,
      %cst_45 = arith.constant 0.000000e+00 : f32
      %48 = vector.broadcast %cst_45 : f32 to vector<8x1xf32>
      %c0_46 = arith.constant 0 : index
      %c0_47 = arith.constant 0 : index
      %49 = vector.load %arg9[%c0_46, %c0_47] : memref<8x1xf32, #tpu.memory_space<vmem>>, vector<8x1xf32>
      tpu.vector_store %arg9[%c0_46, %c0_47], %48 {strides = array<i32>} : memref<8x1xf32, #tpu.memory_space<vmem>>, vector<8x1xf32>,
    } else {
    }
    %c0 = arith.constant 0 : index
    %c0_1 = arith.constant 0 : index
    %3 = vector.load %arg2[%c0, %c0_1] : memref<8x256xf32, #tpu.memory_space<vmem>>, vector<8x256xf32>
    %c0_2 = arith.constant 0 : index
    %c0_3 = arith.constant 0 : index
    %4 = vector.load %arg3[%c0_2, %c0_3] : memref<8x256xf32, #tpu.memory_space<vmem>>, vector<8x256xf32>
    %c0_4 = arith.constant 0 : index
    %c0_5 = arith.constant 0 : index
    %5 = vector.load %arg4[%c0_4, %c0_5] : memref<8x256xf32, #tpu.memory_space<vmem>>, vector<8x256xf32>
    %cst = arith.constant 0.000000e+00 : f32
    %6 = vector.broadcast %cst : f32 to vector<8x256xf32>
    %7 = arith.subf %6, %3 : vector<8x256xf32>
    %8 = math.exp %7 : vector<8x256xf32>
    %cst_6 = arith.constant 1.000000e+00 : f32
    %9 = vector.broadcast %cst_6 : f32 to vector<8x256xf32>
    %10 = arith.addf %9, %8 : vector<8x256xf32>
    %cst_7 = arith.constant 1.000000e+00 : f32
    %11 = vector.broadcast %cst_7 : f32 to vector<8x256xf32>
    %12 = arith.divf %11, %10 : vector<8x256xf32>
    %c0_8 = arith.constant 0 : index
    %c0_9 = arith.constant 0 : index
    %13 = vector.load %arg5[%c0_8, %c0_9] : memref<8x1xf32, #tpu.memory_space<vmem>>, vector<8x1xf32>
    %cst_10 = arith.constant dense<0.000000e+00> : vector<8xf32>
    %14 = vector.multi_reduction <add>, %12, %cst_10 [1] : vector<8x256xf32> to vector<8xf32>
    %15 = vector.shape_cast %14 : vector<8xf32> to vector<8x1xf32>
    %16 = arith.addf %13, %15 : vector<8x1xf32>
    %c0_11 = arith.constant 0 : index
    %c0_12 = arith.constant 0 : index
    %17 = vector.load %arg5[%c0_11, %c0_12] : memref<8x1xf32, #tpu.memory_space<vmem>>, vector<8x1xf32>
    tpu.vector_store %arg5[%c0_11, %c0_12], %16 {strides = array<i32>} : memref<8x1xf32, #tpu.memory_space<vmem>>, vector<8x1xf32>,
    %c0_13 = arith.constant 0 : index
    %c0_14 = arith.constant 0 : index
    %18 = vector.load %arg6[%c0_13, %c0_14] : memref<8x1xf32, #tpu.memory_space<vmem>>, vector<8x1xf32>
    %cst_15 = arith.constant dense<0.000000e+00> : vector<8xf32>
    %19 = vector.multi_reduction <add>, %4, %cst_15 [1] : vector<8x256xf32> to vector<8xf32>
    %20 = vector.shape_cast %19 : vector<8xf32> to vector<8x1xf32>
    %21 = arith.addf %18, %20 : vector<8x1xf32>
    %c0_16 = arith.constant 0 : index
    %c0_17 = arith.constant 0 : index
    %22 = vector.load %arg6[%c0_16, %c0_17] : memref<8x1xf32, #tpu.memory_space<vmem>>, vector<8x1xf32>
    tpu.vector_store %arg6[%c0_16, %c0_17], %21 {strides = array<i32>} : memref<8x1xf32, #tpu.memory_space<vmem>>, vector<8x1xf32>,
    %c0_18 = arith.constant 0 : index
    %c0_19 = arith.constant 0 : index
    %23 = vector.load %arg7[%c0_18, %c0_19] : memref<8x1xf32, #tpu.memory_space<vmem>>, vector<8x1xf32>
    %cst_20 = arith.constant dense<0.000000e+00> : vector<8xf32>
    %24 = vector.multi_reduction <add>, %5, %cst_20 [1] : vector<8x256xf32> to vector<8xf32>
    %25 = vector.shape_cast %24 : vector<8xf32> to vector<8x1xf32>
    %26 = arith.addf %23, %25 : vector<8x1xf32>
    %c0_21 = arith.constant 0 : index
    %c0_22 = arith.constant 0 : index
    %27 = vector.load %arg7[%c0_21, %c0_22] : memref<8x1xf32, #tpu.memory_space<vmem>>, vector<8x1xf32>
    tpu.vector_store %arg7[%c0_21, %c0_22], %26 {strides = array<i32>} : memref<8x1xf32, #tpu.memory_space<vmem>>, vector<8x1xf32>,
    %c0_23 = arith.constant 0 : index
    %c0_24 = arith.constant 0 : index
    %28 = vector.load %arg8[%c0_23, %c0_24] : memref<8x1xf32, #tpu.memory_space<vmem>>, vector<8x1xf32>
    %29 = arith.mulf %12, %4 : vector<8x256xf32>
    %cst_25 = arith.constant dense<0.000000e+00> : vector<8xf32>
    %30 = vector.multi_reduction <add>, %29, %cst_25 [1] : vector<8x256xf32> to vector<8xf32>
    %31 = vector.shape_cast %30 : vector<8xf32> to vector<8x1xf32>
    %32 = arith.addf %28, %31 : vector<8x1xf32>
    %c0_26 = arith.constant 0 : index
    %c0_27 = arith.constant 0 : index
    %33 = vector.load %arg8[%c0_26, %c0_27] : memref<8x1xf32, #tpu.memory_space<vmem>>, vector<8x1xf32>
    tpu.vector_store %arg8[%c0_26, %c0_27], %32 {strides = array<i32>} : memref<8x1xf32, #tpu.memory_space<vmem>>, vector<8x1xf32>,
    %c0_28 = arith.constant 0 : index
    %c0_29 = arith.constant 0 : index
    %34 = vector.load %arg9[%c0_28, %c0_29] : memref<8x1xf32, #tpu.memory_space<vmem>>, vector<8x1xf32>
    %35 = arith.mulf %12, %5 : vector<8x256xf32>
    %cst_30 = arith.constant dense<0.000000e+00> : vector<8xf32>
    %36 = vector.multi_reduction <add>, %35, %cst_30 [1] : vector<8x256xf32> to vector<8xf32>
    %37 = vector.shape_cast %36 : vector<8xf32> to vector<8x1xf32>
    %38 = arith.addf %34, %37 : vector<8x1xf32>
    %c0_31 = arith.constant 0 : index
    %c0_32 = arith.constant 0 : index
    %39 = vector.load %arg9[%c0_31, %c0_32] : memref<8x1xf32, #tpu.memory_space<vmem>>, vector<8x1xf32>
    tpu.vector_store %arg9[%c0_31, %c0_32], %38 {strides = array<i32>} : memref<8x1xf32, #tpu.memory_space<vmem>>, vector<8x1xf32>,
    return
  }
  func.func @transform_0(%arg0: i32, %arg1: i32) -> (i32, i32) {
    %c0_i32 = arith.constant 0 : i32
    return %arg0, %arg1 : i32, i32
  }
  func.func @transform_1(%arg0: i32, %arg1: i32) -> (i32, i32) {
    %c0_i32 = arith.constant 0 : i32
    return %arg0, %arg1 : i32, i32
  }
  func.func @transform_2(%arg0: i32, %arg1: i32) -> (i32, i32) {
    %c0_i32 = arith.constant 0 : i32
    return %arg0, %arg1 : i32, i32
  }
  func.func @transform_3(%arg0: i32, %arg1: i32) -> (i32, i32) {
    %c0_i32 = arith.constant 0 : i32
    %c0_i32_0 = arith.constant 0 : i32
    return %arg0, %c0_i32 : i32, i32
  }
  func.func @transform_4(%arg0: i32, %arg1: i32) -> (i32, i32) {
    %c0_i32 = arith.constant 0 : i32
    %c0_i32_0 = arith.constant 0 : i32
    return %arg0, %c0_i32 : i32, i32
  }
  func.func @transform_5(%arg0: i32, %arg1: i32) -> (i32, i32) {
    %c0_i32 = arith.constant 0 : i32
    %c0_i32_0 = arith.constant 0 : i32
    return %arg0, %c0_i32 : i32, i32
  }
  func.func @transform_6(%arg0: i32, %arg1: i32) -> (i32, i32) {
    %c0_i32 = arith.constant 0 : i32
    %c0_i32_0 = arith.constant 0 : i32
    return %arg0, %c0_i32 : i32, i32
  }
  func.func @transform_7(%arg0: i32, %arg1: i32) -> (i32, i32) {
    %c0_i32 = arith.constant 0 : i32
    %c0_i32_0 = arith.constant 0 : i32
    return %arg0, %c0_i32 : i32, i32
  }
}

</mosaic_0001>

<bundles_post_ra>
// kernel: tpu_custom_call.1
= control target key start
LH: loop header
LB: loop body
LE: loop exit
PB: predicated region body
PF: predicated region fallthrough
CT: control target
= control target key end

     0   :  { %13 = vsyncpa [#allocation3], 0  ;;  %s323_s0 = inlined_call_operand.hbm [shape: f32[8,256], index: 0, kind: input, shape index: {}]   ;;  %s324_s1 = inlined_call_operand.hbm [shape: f32[8,256], index: 1, kind: input, shape index: {}]   ;;  %s325_s2 = inlined_call_operand.hbm [shape: f32[8,256], index: 2, kind: input, shape index: {}]   ;;  %s326_s3 = inlined_call_operand.vmem [shape: f32[8,1], index: 3, kind: output, shape index: {0}]   ;;  %s327_s4 = inlined_call_operand.vmem [shape: f32[8,1], index: 4, kind: output, shape index: {1}]   ;;  %s328_s5 = inlined_call_operand.vmem [shape: f32[8,1], index: 5, kind: output, shape index: {2}]   ;;  %s329_s6 = inlined_call_operand.vmem [shape: f32[8,1], index: 6, kind: output, shape index: {3}]   ;;  %s330_s7 = inlined_call_operand.vmem [shape: f32[8,1], index: 7, kind: output, shape index: {4}]  }
   0x1   :  { %14 = vsyncpa [#allocation5], 0  ;;  %s215_s24 = smov [#allocation4]   ;;  %s216_s26 = smov [#allocation2]  }
   0x2   :  { %s31_s25 = sshll.u32 %s215_s24, 4  ;;  %s21_s27 = sshll.u32 %s216_s26, 4  ;;  %s32_s25 = int_to_ptr.vmem [resolvable:$true] %s31_s25  ;;  %s22_s27 = int_to_ptr.vmem [resolvable:$true] %s21_s27 }
   0x3   :  { %s159_s28 = scalar_lea.vmem %s32_s25, 256  ;;  %p164_p1 = scmp.lt.s32.totalorder %s32_s25, %s32_s25 }
   0x4   :  { %p160_p0 = scmp.ne.s32.totalorder %s32_s25, %s159_s28  ;;  %p165_p2 = scmp.lt.s32.totalorder %s159_s28, %s159_s28 }
   0x6   :  { %p166_p3 = por %p165_p2, %p164_p1 }
   0x8   :  { %p167_p4 = pnand %p166_p3, %p160_p0 }
   0xa   :  { %170 = shalt.err (!%p167_p4)
}
   0xb   :  { %34 = dma.hbm_to_vmem [thread:$0]  %s324_s1, 256, %s32_s25, [#allocation5]  }
   0xc   :  { %s179_s8 = scalar_lea.vmem %s22_s27, 256  ;;  %p184_p6 = scmp.lt.s32.totalorder %s22_s27, %s22_s27 }
   0xd   :  { %p180_p5 = scmp.ne.s32.totalorder %s22_s27, %s179_s8  ;;  %p185_p7 = scmp.lt.s32.totalorder %s179_s8, %s179_s8 }
   0xf   :  { %p186_p8 = por %p185_p7, %p184_p6 }
  0x11   :  { %p187_p9 = pnand %p186_p8, %p180_p5 }
  0x13   :  { %190 = shalt.err (!%p187_p9)
}
  0x14   :  { %24 = dma.hbm_to_vmem [thread:$0]  %s323_s0, 256, %s22_s27, [#allocation3]  }
  0x15   :  { %s217_s11 = smov [#allocation6]  }
  0x16   :  { %s41_s12 = sshll.u32 %s217_s11, 4  ;;  %s42_s12 = int_to_ptr.vmem [resolvable:$true] %s41_s12 }
  0x17   :  { %s199_s13 = scalar_lea.vmem %s42_s12, 256  ;;  %p204_p11 = scmp.lt.s32.totalorder %s42_s12, %s42_s12 }
  0x18   :  { %p200_p10 = scmp.ne.s32.totalorder %s42_s12, %s199_s13  ;;  %p205_p12 = scmp.lt.s32.totalorder %s199_s13, %s199_s13 }
  0x1a   :  { %p206_p13 = por %p205_p12, %p204_p11 }
  0x1c   :  { %p207_p0 = pnand %p206_p13, %p200_p10 }
  0x1e   :  { %210 = shalt.err (!%p207_p0)
}
  0x1f   :  { %44 = dma.hbm_to_vmem [thread:$0]  %s325_s2, 256, %s42_s12, [#allocation5]  }
  0x20   :  { %211 = dma.done.wait [#allocation3], 256  }
  0x21   :  { %212 = vsyncadd [#allocation3], 4294967040 }
  0x22   :  { %213 = dma.done.wait [#allocation5], 512  }
  0x23   :  { %214 = vsyncadd [#allocation5], 4294966784  ;;  %vm58_vm0 = vcmask 7168   ;;  %v218_v0 = vmov 0.0   ;;  %v66_v1 = vld [vmem:[#allocation4] sm:$0xff]  ;;  %v67_v2 = vld [vmem:[#allocation4 + $0x8] sm:$0xff] }
  0x24   :  { %60 = vst.msk [vmem:[%s327_s4] sm:$0xff] %vm58_vm0, %v218_v0  ;;  %59 = vst.msk [vmem:[%s326_s3] sm:$0xff] %vm58_vm0, %v218_v0  ;;  %v64_v3 = vld [vmem:[#allocation2] sm:$0xff]  ;;  %v90_v4 = vadd.f32 %v67_v2, %v66_v1  ;;  %v65_v5 = vld [vmem:[#allocation2 + $0x8] sm:$0xff] }
  0x25   :  { %61 = vst.msk [vmem:[%s328_s5] sm:$0xff] %vm58_vm0, %v218_v0  ;;  %62 = vst.msk [vmem:[%s329_s6] sm:$0xff] %vm58_vm0, %v218_v0  ;;  %v70_v6 = vsub.f32 0.0, %v64_v3  ;;  %v68_v7 = vld [vmem:[#allocation6] sm:$0xff]  ;;  %v69_v8 = vld [vmem:[#allocation6 + $0x8] sm:$0xff]  ;;  %v71_v9 = vsub.f32 0.0, %v65_v5 }
  0x26   :  { %63 = vst.msk [vmem:[%s330_s7] sm:$0xff] %vm58_vm0, %v218_v0  ;;  %v96_v10 = vadd.f32 %v69_v8, %v68_v7  ;;  %91 = vadd.xlane.f32.xlu0 %v90_v4 }
  0x27   :  { %v72_v11 = vmul.f32 1.442695, %v70_v6  ;;  %v74_v12 = vmul.f32 1.442695, %v71_v9 }
  0x28   :  { %97 = vadd.xlane.f32.xlu1 %v96_v10 }
  0x29   :  { %143 = vpow2.f32 %v72_v11 }
  0x2a   :  { %145 = vpow2.f32 %v74_v12 }
  0x2b   :  { %v89_v26 = vld [vmem:[%s327_s4] sm:$0xff] }
  0x2c   :  { %v95_v27 = vld [vmem:[%s328_s5] sm:$0xff] }
  0x2d   :  { %v82_v32 = vld [vmem:[%s326_s3] sm:$0xff] }
  0x2e   :  { %v101_v34 = vld [vmem:[%s329_s6] sm:$0xff] }
  0x2f   :  { %v109_v37 = vld [vmem:[%s330_s7] sm:$0xff] }
  0x36   :  { %v144_v13 = vpop.eup %143 }
  0x37   :  { %v146_v14 = vpop.eup %145  ;;  %v76_v15 = vadd.f32 1.0, %v144_v13 }
  0x38   :  { %v77_v16 = vadd.f32 1.0, %v146_v14 }
  0x39   :  { %147 = vrcp.f32 %v76_v15 }
  0x3a   :  { %149 = vrcp.f32 %v77_v16 }
  0x46   :  { %v148_v17 = vpop.eup %147 }
  0x47   :  { %v150_v18 = vpop.eup %149  ;;  %v102_v19 = vmul.f32 %v148_v17, %v66_v1  ;;  %v110_v20 = vmul.f32 %v148_v17, %v68_v7 }
  0x48   :  { %v103_v21 = vmul.f32 %v150_v18, %v67_v2  ;;  %v111_v22 = vmul.f32 %v150_v18, %v69_v8  ;;  %v83_v23 = vadd.f32 %v150_v18, %v148_v17 }
  0x4a   :  { %84 = vadd.xlane.f32.xlu0 %v83_v23  ;;  %v104_v24 = vadd.f32 %v103_v21, %v102_v19  ;;  %v112_v25 = vadd.f32 %v111_v22, %v110_v20 }
  0x4c   :  { %105 = vadd.xlane.f32.xlu1 %v104_v24 }
  0x4e   :  { %113 = vadd.xlane.f32.xlu0 %v112_v25 }
  0xaf   :  { %v92_v28 = vpop.xlane.xlu0 %91 }
  0xb0   :  { %v93_v29 = vadd.f32 %v92_v28, %v89_v26 }
  0xb1   :  { %v98_v30 = vpop.xlane.xlu1 %97 }
  0xb2   :  { %v99_v31 = vadd.f32 %v98_v30, %v95_v27  ;;  %94 = vst.msk [vmem:[%s327_s4] sm:$0xff] %vm58_vm0, %v93_v29 }
  0xb4   :  { %100 = vst.msk [vmem:[%s328_s5] sm:$0xff] %vm58_vm0, %v99_v31 }
  0xd3   :  { %v85_v33 = vpop.xlane.xlu0 %84 }
  0xd4   :  { %v86_v35 = vadd.f32 %v85_v33, %v82_v32 }
  0xd5   :  { %v106_v36 = vpop.xlane.xlu1 %105 }
  0xd6   :  { %88 = vst.msk [vmem:[%s326_s3] sm:$0xff] %vm58_vm0, %v86_v35  ;;  %v107_v38 = vadd.f32 %v106_v36, %v101_v34 }
  0xd7   :  { %v114_v39 = vpop.xlane.xlu0 %113 }
  0xd8   :  { %108 = vst.msk [vmem:[%s329_s6] sm:$0xff] %vm58_vm0, %v107_v38  ;;  %v115_v40 = vadd.f32 %v114_v39, %v109_v37 }
  0xda   :  { %116 = vst.msk [vmem:[%s330_s7] sm:$0xff] %vm58_vm0, %v115_v40 }
  0xdb   :  { %137 = vsyncpa [#allocation3], 1 }
  0xdc   :  { %138 = vsyncpa [#allocation5], 1 }

</bundles_post_ra>
